<compile_context>
chip_gen: v5e
topology: v5e:2x2
jax: 0.10.0
libtpu: 0.0.40
codegen_flags: <defaults>
</compile_context>

<pallas_src>
import functools

import jax
import jax.numpy as jnp
from jax.experimental import pallas as pl
from jax.experimental.pallas import tpu as pltpu


def _round_up(x, m):
    return (x + m - 1) // m * m


def _cl_kernel(fa_ref, fc_ref, lab_a_ref, lab_c_ref, out_ref,
               a_ref, m_ref, l_ref, s_ref, c_ref,
               *, inv_temp, n_valid, padded, mm_dtype):
    """One (contrast_tile x anchor_tile) step of the online-softmax SupCon loss.

    sim[c, r] = <f_c, f_r> / temperature, so per-anchor reductions run over the
    sublane axis (axis=0) and every running statistic is lane-dense (1, T).
    """
    i = pl.program_id(0)          # anchor tile    -> lanes ("parallel")
    j = pl.program_id(1)          # contrast tile  -> sublanes (reduction, "arbitrary")
    n_ct = pl.num_programs(1)

    @pl.when(j == 0)
    def _init():
        # Anchor block is resident across the whole j loop: scale by 1/temp and
        # cast to the matmul dtype ONCE per anchor tile (not per grid step).
        a_ref[...] = (fa_ref[...].astype(jnp.float32) * inv_temp).astype(mm_dtype)
        m_ref[...] = jnp.full(m_ref.shape, -jnp.inf, jnp.float32)
        l_ref[...] = jnp.zeros(l_ref.shape, jnp.float32)
        s_ref[...] = jnp.zeros(s_ref.shape, jnp.float32)
        c_ref[...] = jnp.zeros(c_ref.shape, jnp.float32)

    # MXU: sim[c, r] = <f_c, f_r / temperature>, f32 accumulate.   (T, T)
    sim = jax.lax.dot_general(
        fc_ref[...], a_ref[...],
        dimension_numbers=(((1,), (1,)), ((), ())),
        preferred_element_type=jnp.float32,
    )
    tc, tr = sim.shape

    # Positives: same label.  Padded contrast rows carry an int32-min sentinel
    # so they never match a real label; the self-contrast diagonal is removed
    # below only on diagonal tiles.  p is built once and reused for s and c.
    p = (lab_c_ref[...] == lab_a_ref[...]).astype(jnp.float32)       # (T, T)

    m_prev = m_ref[...]                                              # (1, T)
    m_new = jnp.maximum(m_prev, jnp.max(sim, axis=0, keepdims=True))
    e = jnp.exp(sim - m_new)                                         # (T, T)

    # Self-contrast masking: with square tiles the diagonal only appears when
    # i == j, so off-diagonal steps skip all the iota/compare/select VPU work.
    def _mask_diag(ops):
        e_, p_ = ops
        sub = jax.lax.broadcasted_iota(jnp.int32, (tc, tr), 0)   # local contrast idx
        lane = jax.lax.broadcasted_iota(jnp.int32, (tc, tr), 1)  # local anchor idx
        off_diag = sub != lane
        return jnp.where(off_diag, e_, 0.0), jnp.where(off_diag, p_, 0.0)

    e, p = jax.lax.cond(i == j, _mask_diag, lambda ops: ops, (e, p))

    if padded:
        # Zero-padded contrast rows only live in the last contrast tile:
        # exclude them from the softmax denominator there.
        def _mask_pad(e_):
            row = jax.lax.broadcasted_iota(jnp.int32, (tc, tr), 0) + j * tc
            return jnp.where(row < n_valid, e_, 0.0)

        e = jax.lax.cond(j == n_ct - 1, _mask_pad, lambda e_: e_, e)

    # ---- online softmax over contrast tiles (lane-dense per-anchor stats) ----
    alpha = jnp.exp(m_prev - m_new)
    l_ref[...] = alpha * l_ref[...] + jnp.sum(e, axis=0, keepdims=True)
    m_ref[...] = m_new
    s_ref[...] += jnp.sum(p * sim, axis=0, keepdims=True)
    c_ref[...] += jnp.sum(p, axis=0, keepdims=True)

    @pl.when(j == n_ct - 1)
    def _finalize():
        # mean_log_prob_pos = sum_pos(sim)/cnt - log(sum_valid exp(sim))
        #                   = s/c - (m + log l);   loss = -mean_log_prob_pos
        log_denom = m_ref[...] + jnp.log(l_ref[...])
        loss_row = log_denom - s_ref[...] / c_ref[...]               # (1, T)
        out_ref[...] = loss_row.reshape(1, 1, tr)


def cl_loss(features, labels, temperature, *, tile=None, use_bf16_matmul=True):
    """SupCon loss (CL.forward). features: [B, V, D] float, labels: [B] int."""
    B, V, D = features.shape
    if labels.shape[0] != B:
        raise ValueError("Num of labels does not match num of features")
    N = B * V

    mm_dtype = jnp.bfloat16 if use_bf16_matmul else jnp.float32
    in_bytes = 2 if use_bf16_matmul else 4

    # torch.cat(torch.unbind(features, dim=1), dim=0)  -> view-major [N, D].
    # Cast to the matmul dtype ONCE here: the contrast stream is fetched nt^2
    # times, so bf16 halves its HBM traffic and its VMEM buffers.
    contrast = jnp.transpose(features, (1, 0, 2)).reshape(N, D).astype(mm_dtype)
    lab = jnp.tile(labels.reshape(-1).astype(jnp.int32), V)

    # ---- generation-aware VMEM budget (v5e/v6e: 128 MiB, v7x: 64 MiB/TC) ----
    try:
        vmem_cap = int(pltpu.get_tpu_info().vmem_capacity_bytes)
    except Exception:  # interpret mode / older runtimes
        vmem_cap = 128 * 1024 * 1024
    vmem_budget = min(int(0.80 * vmem_cap), 100 * 1024 * 1024)

    def vmem_need(T, n_contrast_bufs):
        inputs = (2 + n_contrast_bufs) * T * D * in_bytes   # anchor (x2) + contrast bufs
        scaled = T * D * in_bytes                           # inv_temp-scaled anchor scratch
        temps = 6 * T * T * 4                               # (T, T) f32 temporaries
        small = 16 * T * 4 + (2 << 20)                      # stats, labels, slack
        return inputs + scaled + temps + small

    # ---- square tile selection (lane dims must be % 128 when multi-tile) ----
    if tile is None:
        if N <= 128:
            T = max(8, _round_up(N, 8))                     # single full-array tile
        else:
            # Keep >= 2 anchor tiles once N >= 256 so the "parallel" anchor axis
            # can shard across both TensorCores on v7x.
            cap = _round_up((N + 1) // 2, 128) if N >= 256 else 128
            T = 128
            for cand in (512, 256, 128):
                if cand <= cap and vmem_need(cand, 2) <= vmem_budget:
                    T = cand
                    break
            # TODO(synk): for D so large that even T=128 misses the budget, add
            # D-tiling with a (T, T) f32 sim accumulator before the softmax.
    else:
        if N <= tile:
            T = max(8, _round_up(N, 8))
        else:
            if tile % 128 != 0:
                raise ValueError("tile must be a multiple of 128 when N > tile")
            T = tile

    Np = _round_up(N, T)
    padded = Np != N
    if padded:
        contrast = jnp.pad(contrast, ((0, Np - N), (0, 0)))
        lab = jnp.pad(lab, (0, Np - N), constant_values=jnp.iinfo(jnp.int32).min)

    lab_anchor = lab.reshape(1, Np)      # lane-dense anchor labels
    lab_contrast = lab.reshape(Np, 1)    # sublane contrast labels
    nt = Np // T

    # Contrast features are the only per-step DMA stream: deepen its pipeline
    # when D is small and VMEM allows (cheap once inputs are bf16).
    n_bufs = 2
    contrast_spec = pl.BlockSpec((T, D), lambda i, j: (j, 0))
    if nt > 1 and D <= 512 and vmem_need(T, 3) <= vmem_budget:
        try:
            contrast_spec = pl.BlockSpec((T, D), lambda i, j: (j, 0),
                                         pipeline_mode=pl.Buffered(3))
            n_bufs = 3
        except Exception:
            pass  # older JAX without BlockSpec.pipeline_mode: keep double-buffering

    vmem_limit = int(min(vmem_budget,
                         max(32 * 1024 * 1024, vmem_need(T, n_bufs) + (8 << 20))))

    kernel = functools.partial(
        _cl_kernel,
        inv_temp=1.0 / float(temperature),
        n_valid=N,
        padded=padded,
        mm_dtype=mm_dtype,
    )

    out = pl.pallas_call(
        kernel,
        out_shape=jax.ShapeDtypeStruct((nt, 1, T), jnp.float32),
        grid_spec=pltpu.PrefetchScalarGridSpec(
            num_scalar_prefetch=0,
            grid=(nt, nt),                                   # (anchor tiles, contrast tiles)
            in_specs=[
                pl.BlockSpec((T, D), lambda i, j: (i, 0)),   # anchor features (resident)
                contrast_spec,                               # contrast features (streamed)
                pl.BlockSpec((1, T), lambda i, j: (0, i)),   # anchor labels (lanes)
                pl.BlockSpec((T, 1), lambda i, j: (j, 0)),   # contrast labels (sublanes)
            ],
            out_specs=pl.BlockSpec((1, 1, T), lambda i, j: (i, 0, 0)),
            scratch_shapes=[pltpu.VMEM((T, D), mm_dtype)]            # scaled anchor
                          + [pltpu.VMEM((1, T), jnp.float32)] * 4,   # m, l, s, c
        ),
        compiler_params=pltpu.CompilerParams(
            dimension_semantics=("parallel", "arbitrary"),
            vmem_limit_bytes=vmem_limit,
        ),
    )(contrast, contrast, lab_anchor, lab_contrast)

    # loss.view(anchor_count, batch_size).mean() == mean over the N real anchors.
    per_anchor = out.reshape(Np)[:N]
    return jnp.mean(per_anchor)


def cl_loss_ref(features, labels, temperature):
    """Pure-JAX reference mirroring the PyTorch forward exactly."""
    B, V, D = features.shape
    N = B * V
    f = jnp.transpose(features, (1, 0, 2)).reshape(N, D).astype(jnp.float32)
    lab = jnp.tile(labels.reshape(-1), V)
    mask = (lab[:, None] == lab[None, :]).astype(jnp.float32)
    sim = (f @ f.T) / temperature
    logits = sim - jnp.max(sim, axis=1, keepdims=True)
    logits_mask = 1.0 - jnp.eye(N, dtype=jnp.float32)
    mask = mask * logits_mask
    exp_logits = jnp.exp(logits) * logits_mask
    log_prob = logits - jnp.log(exp_logits.sum(1, keepdims=True))
    mean_log_prob_pos = (mask * log_prob).sum(1) / mask.sum(1)
    return jnp.mean(-mean_log_prob_pos)


if __name__ == "__main__":
    temperature = 0.07
    key = jax.random.PRNGKey(0)

    def make_inputs(k, B, V, D, n_classes):
        kf, kl = jax.random.split(k)
        f = jax.random.normal(kf, (B, V, D), dtype=jnp.float32)
        f = f / jnp.linalg.norm(f, axis=-1, keepdims=True)     # typical SupCon input
        lab = jax.random.randint(kl, (B,), 0, n_classes, dtype=jnp.int32)
        return f, lab

    k1, k2 = jax.random.split(key)

    # Case 1: small single-tile problem (B=8, V=2, D=32 -> N=16).
    f1, l1 = make_inputs(k1, 8, 2, 32, 4)
    ref1 = jax.block_until_ready(cl_loss_ref(f1, l1, temperature))

    loss1 = jax.block_until_ready(cl_loss(f1, l1, temperature))     # bf16 MXU (default)
    assert jnp.isfinite(loss1), "loss1 is not finite"
    assert jnp.allclose(loss1, ref1, rtol=1e-1, atol=5e-2), (loss1, ref1)

    loss1_f32 = jax.block_until_ready(
        cl_loss(f1, l1, temperature, use_bf16_matmul=False))
    assert jnp.isfinite(loss1_f32), "loss1_f32 is not finite"
    assert jnp.allclose(loss1_f32, ref1, rtol=1e-3, atol=1e-4), (loss1_f32, ref1)

    # Case 2: multi-tile grid with padding (B=96, V=2, D=160 -> N=192, Np=256,
    # grid (2, 2), T=128) exercising the online reduction + gated diag/pad masks.
    f2, l2 = make_inputs(k2, 96, 2, 160, 6)
    ref2 = jax.block_until_ready(cl_loss_ref(f2, l2, temperature))

    loss2 = jax.block_until_ready(cl_loss(f2, l2, temperature))     # bf16 MXU (default)
    assert jnp.isfinite(loss2), "loss2 is not finite"
    assert jnp.allclose(loss2, ref2, rtol=1e-1, atol=5e-2), (loss2, ref2)

    loss2_f32 = jax.block_until_ready(
        cl_loss(f2, l2, temperature, use_bf16_matmul=False))
    assert jnp.isfinite(loss2_f32), "loss2_f32 is not finite"
    assert jnp.allclose(loss2_f32, ref2, rtol=1e-3, atol=1e-4), (loss2_f32, ref2)

    print("KERNEL_OK")
</pallas_src>

<mosaic_0001>
module attributes {stable_mosaic.version = 11 : i64} {
  func.func @_cl_kernel(%arg0: i32, %arg1: i32, %arg2: memref<16x32xbf16, #tpu.memory_space<vmem>>, %arg3: memref<16x32xbf16, #tpu.memory_space<vmem>>, %arg4: memref<1x16xi32, #tpu.memory_space<vmem>>, %arg5: memref<16x1xi32, #tpu.memory_space<vmem>>, %arg6: memref<1x1x16xf32, #tpu.memory_space<vmem>>, %arg7: memref<16x32xbf16, #tpu.memory_space<vmem>>, %arg8: memref<1x16xf32, #tpu.memory_space<vmem>>, %arg9: memref<1x16xf32, #tpu.memory_space<vmem>>, %arg10: memref<1x16xf32, #tpu.memory_space<vmem>>, %arg11: memref<1x16xf32, #tpu.memory_space<vmem>>) attributes {dimension_semantics = [#tpu.dimension_semantics<parallel>, #tpu.dimension_semantics<arbitrary>], iteration_bounds = array<i64: 1, 1>, scalar_prefetch = 0 : i64, scratch_operands = 5 : i64, tpu.core_type = #tpu.core_type<tc>, window_params = [{transform_indices = @transform_0, window_bounds = array<i64: 16, 32>}, {transform_indices = @transform_1, window_bounds = array<i64: 16, 32>}, {transform_indices = @transform_2, window_bounds = array<i64: 1, 16>}, {transform_indices = @transform_3, window_bounds = array<i64: 16, 1>}, {transform_indices = @transform_4, window_bounds = array<i64: 1, 1, 16>}]} {
    %c0_i32 = arith.constant 0 : i32
    %0 = arith.cmpi eq, %arg1, %c0_i32 : i32
    %1 = arith.extui %0 : i1 to i32
    %c0_i32_0 = arith.constant 0 : i32
    %2 = arith.cmpi ne, %1, %c0_i32_0 : i32
    scf.if %2 {
      %c0_31 = arith.constant 0 : index
      %c0_32 = arith.constant 0 : index
      %47 = vector.load %arg2[%c0_31, %c0_32] : memref<16x32xbf16, #tpu.memory_space<vmem>>, vector<16x32xbf16>
      %48 = arith.extf %47 : vector<16x32xbf16> to vector<16x32xf32>
      %cst_33 = arith.constant 14.2857141 : f32
      %49 = vector.broadcast %cst_33 : f32 to vector<16x32xf32>
      %50 = arith.mulf %48, %49 : vector<16x32xf32>
      %51 = arith.truncf %50 : vector<16x32xf32> to vector<16x32xbf16>
      %c0_34 = arith.constant 0 : index
      %c0_35 = arith.constant 0 : index
      %52 = vector.load %arg7[%c0_34, %c0_35] : memref<16x32xbf16, #tpu.memory_space<vmem>>, vector<16x32xbf16>
      tpu.vector_store %arg7[%c0_34, %c0_35], %51 {strides = array<i32>} : memref<16x32xbf16, #tpu.memory_space<vmem>>, vector<16x32xbf16>,
      %cst_36 = arith.constant 0xFF800000 : f32
      %53 = vector.broadcast %cst_36 : f32 to vector<1x16xf32>
      %c0_37 = arith.constant 0 : index
      %c0_38 = arith.constant 0 : index
      %54 = vector.load %arg8[%c0_37, %c0_38] : memref<1x16xf32, #tpu.memory_space<vmem>>, vector<1x16xf32>
      tpu.vector_store %arg8[%c0_37, %c0_38], %53 {strides = array<i32>} : memref<1x16xf32, #tpu.memory_space<vmem>>, vector<1x16xf32>,
      %cst_39 = arith.constant 0.000000e+00 : f32
      %55 = vector.broadcast %cst_39 : f32 to vector<1x16xf32>
      %c0_40 = arith.constant 0 : index
      %c0_41 = arith.constant 0 : index
      %56 = vector.load %arg9[%c0_40, %c0_41] : memref<1x16xf32, #tpu.memory_space<vmem>>, vector<1x16xf32>
      tpu.vector_store %arg9[%c0_40, %c0_41], %55 {strides = array<i32>} : memref<1x16xf32, #tpu.memory_space<vmem>>, vector<1x16xf32>,
      %cst_42 = arith.constant 0.000000e+00 : f32
      %57 = vector.broadcast %cst_42 : f32 to vector<1x16xf32>
      %c0_43 = arith.constant 0 : index
      %c0_44 = arith.constant 0 : index
      %58 = vector.load %arg10[%c0_43, %c0_44] : memref<1x16xf32, #tpu.memory_space<vmem>>, vector<1x16xf32>
      tpu.vector_store %arg10[%c0_43, %c0_44], %57 {strides = array<i32>} : memref<1x16xf32, #tpu.memory_space<vmem>>, vector<1x16xf32>,
      %cst_45 = arith.constant 0.000000e+00 : f32
      %59 = vector.broadcast %cst_45 : f32 to vector<1x16xf32>
      %c0_46 = arith.constant 0 : index
      %c0_47 = arith.constant 0 : index
      %60 = vector.load %arg11[%c0_46, %c0_47] : memref<1x16xf32, #tpu.memory_space<vmem>>, vector<1x16xf32>
      tpu.vector_store %arg11[%c0_46, %c0_47], %59 {strides = array<i32>} : memref<1x16xf32, #tpu.memory_space<vmem>>, vector<1x16xf32>,
    } else {
    }
    %c0 = arith.constant 0 : index
    %c0_1 = arith.constant 0 : index
    %3 = vector.load %arg3[%c0, %c0_1] : memref<16x32xbf16, #tpu.memory_space<vmem>>, vector<16x32xbf16>
    %c0_2 = arith.constant 0 : index
    %c0_3 = arith.constant 0 : index
    %4 = vector.load %arg7[%c0_2, %c0_3] : memref<16x32xbf16, #tpu.memory_space<vmem>>, vector<16x32xbf16>
    %cst = arith.constant dense<0.000000e+00> : vector<16x16xf32>
    %5 = tpu.matmul %3, %4, %cst {dimension_numbers = #tpu.dot_dimension_numbers<[1], [1], [0], [0], [0, 0, 1, 0], [], []>} : vector<16x32xbf16>, vector<16x32xbf16>, vector<16x16xf32> -> vector<16x16xf32>
    %c0_4 = arith.constant 0 : index
    %c0_5 = arith.constant 0 : index
    %6 = vector.load %arg5[%c0_4, %c0_5] : memref<16x1xi32, #tpu.memory_space<vmem>>, vector<16x1xi32>
    %c0_6 = arith.constant 0 : index
    %c0_7 = arith.constant 0 : index
    %7 = vector.load %arg4[%c0_6, %c0_7] : memref<1x16xi32, #tpu.memory_space<vmem>>, vector<1x16xi32>
    %8 = vector.broadcast %6 : vector<16x1xi32> to vector<16x16xi32>
    %9 = vector.broadcast %7 : vector<1x16xi32> to vector<16x16xi32>
    %10 = arith.cmpi eq, %8, %9 : vector<16x16xi32>
    %11 = arith.extui %10 : vector<16x16xi1> to vector<16x16xi32>
    %12 = arith.sitofp %11 : vector<16x16xi32> to vector<16x16xf32>
    %c0_8 = arith.constant 0 : index
    %c0_9 = arith.constant 0 : index
    %13 = vector.load %arg8[%c0_8, %c0_9] : memref<1x16xf32, #tpu.memory_space<vmem>>, vector<1x16xf32>
    %cst_10 = arith.constant dense<0xFF800000> : vector<16xf32>
    %14 = vector.multi_reduction <maximumf>, %5, %cst_10 [0] : vector<16x16xf32> to vector<16xf32>
    %15 = vector.shape_cast %14 : vector<16xf32> to vector<1x16xf32>
    %16 = arith.maximumf %13, %15 : vector<1x16xf32>
    %17 = vector.broadcast %16 : vector<1x16xf32> to vector<16x16xf32>
    %18 = arith.subf %5, %17 : vector<16x16xf32>
    %19 = math.exp %18 : vector<16x16xf32>
    %20 = arith.cmpi eq, %arg0, %arg1 : i32
    %21 = arith.extui %20 : i1 to i32
    %c0_i32_11 = arith.constant 0 : i32
    %22 = arith.cmpi ne, %21, %c0_i32_11 : i32
    %23:2 = scf.if %22 -> (vector<16x16xf32>, vector<16x16xf32>) {
      %47 = tpu.iota {dimensions = array<i32: 0>} : vector<16x16xi32>
      %48 = tpu.iota {dimensions = array<i32: 1>} : vector<16x16xi32>
      %49 = arith.cmpi ne, %47, %48 : vector<16x16xi32>
      %cst_31 = arith.constant 0.000000e+00 : f32
      %50 = vector.broadcast %cst_31 : f32 to vector<16x16xf32>
      %51 = arith.select %49, %19, %50 : vector<16x16xi1>, vector<16x16xf32>
      %cst_32 = arith.constant 0.000000e+00 : f32
      %52 = vector.broadcast %cst_32 : f32 to vector<16x16xf32>
      %53 = arith.select %49, %12, %52 : vector<16x16xi1>, vector<16x16xf32>
      scf.yield %51, %53 : vector<16x16xf32>, vector<16x16xf32>
    } else {
      scf.yield %19, %12 : vector<16x16xf32>, vector<16x16xf32>
    }
    %24 = arith.subf %13, %16 : vector<1x16xf32>
    %25 = math.exp %24 : vector<1x16xf32>
    %c0_12 = arith.constant 0 : index
    %c0_13 = arith.constant 0 : index
    %26 = vector.load %arg9[%c0_12, %c0_13] : memref<1x16xf32, #tpu.memory_space<vmem>>, vector<1x16xf32>
    %27 = arith.mulf %25, %26 : vector<1x16xf32>
    %cst_14 = arith.constant dense<0.000000e+00> : vector<16xf32>
    %28 = vector.multi_reduction <add>, %23#0, %cst_14 [0] : vector<16x16xf32> to vector<16xf32>
    %29 = vector.shape_cast %28 : vector<16xf32> to vector<1x16xf32>
    %30 = arith.addf %27, %29 : vector<1x16xf32>
    %c0_15 = arith.constant 0 : index
    %c0_16 = arith.constant 0 : index
    %31 = vector.load %arg9[%c0_15, %c0_16] : memref<1x16xf32, #tpu.memory_space<vmem>>, vector<1x16xf32>
    tpu.vector_store %arg9[%c0_15, %c0_16], %30 {strides = array<i32>} : memref<1x16xf32, #tpu.memory_space<vmem>>, vector<1x16xf32>,
    %c0_17 = arith.constant 0 : index
    %c0_18 = arith.constant 0 : index
    %32 = vector.load %arg8[%c0_17, %c0_18] : memref<1x16xf32, #tpu.memory_space<vmem>>, vector<1x16xf32>
    tpu.vector_store %arg8[%c0_17, %c0_18], %16 {strides = array<i32>} : memref<1x16xf32, #tpu.memory_space<vmem>>, vector<1x16xf32>,
    %c0_19 = arith.constant 0 : index
    %c0_20 = arith.constant 0 : index
    %33 = vector.load %arg10[%c0_19, %c0_20] : memref<1x16xf32, #tpu.memory_space<vmem>>, vector<1x16xf32>
    %34 = arith.mulf %23#1, %5 : vector<16x16xf32>
    %cst_21 = arith.constant dense<0.000000e+00> : vector<16xf32>
    %35 = vector.multi_reduction <add>, %34, %cst_21 [0] : vector<16x16xf32> to vector<16xf32>
    %36 = vector.shape_cast %35 : vector<16xf32> to vector<1x16xf32>
    %37 = arith.addf %33, %36 : vector<1x16xf32>
    %c0_22 = arith.constant 0 : index
    %c0_23 = arith.constant 0 : index
    %38 = vector.load %arg10[%c0_22, %c0_23] : memref<1x16xf32, #tpu.memory_space<vmem>>, vector<1x16xf32>
    tpu.vector_store %arg10[%c0_22, %c0_23], %37 {strides = array<i32>} : memref<1x16xf32, #tpu.memory_space<vmem>>, vector<1x16xf32>,
    %c0_24 = arith.constant 0 : index
    %c0_25 = arith.constant 0 : index
    %39 = vector.load %arg11[%c0_24, %c0_25] : memref<1x16xf32, #tpu.memory_space<vmem>>, vector<1x16xf32>
    %cst_26 = arith.constant dense<0.000000e+00> : vector<16xf32>
    %40 = vector.multi_reduction <add>, %23#1, %cst_26 [0] : vector<16x16xf32> to vector<16xf32>
    %41 = vector.shape_cast %40 : vector<16xf32> to vector<1x16xf32>
    %42 = arith.addf %39, %41 : vector<1x16xf32>
    %c0_27 = arith.constant 0 : index
    %c0_28 = arith.constant 0 : index
    %43 = vector.load %arg11[%c0_27, %c0_28] : memref<1x16xf32, #tpu.memory_space<vmem>>, vector<1x16xf32>
    tpu.vector_store %arg11[%c0_27, %c0_28], %42 {strides = array<i32>} : memref<1x16xf32, #tpu.memory_space<vmem>>, vector<1x16xf32>,
    %c0_i32_29 = arith.constant 0 : i32
    %44 = arith.cmpi eq, %arg1, %c0_i32_29 : i32
    %45 = arith.extui %44 : i1 to i32
    %c0_i32_30 = arith.constant 0 : i32
    %46 = arith.cmpi ne, %45, %c0_i32_30 : i32
    scf.if %46 {
      %c0_31 = arith.constant 0 : index
      %c0_32 = arith.constant 0 : index
      %47 = vector.load %arg8[%c0_31, %c0_32] : memref<1x16xf32, #tpu.memory_space<vmem>>, vector<1x16xf32>
      %c0_33 = arith.constant 0 : index
      %c0_34 = arith.constant 0 : index
      %48 = vector.load %arg9[%c0_33, %c0_34] : memref<1x16xf32, #tpu.memory_space<vmem>>, vector<1x16xf32>
      %49 = math.log %48 : vector<1x16xf32>
      %50 = arith.addf %47, %49 : vector<1x16xf32>
      %c0_35 = arith.constant 0 : index
      %c0_36 = arith.constant 0 : index
      %51 = vector.load %arg10[%c0_35, %c0_36] : memref<1x16xf32, #tpu.memory_space<vmem>>, vector<1x16xf32>
      %c0_37 = arith.constant 0 : index
      %c0_38 = arith.constant 0 : index
      %52 = vector.load %arg11[%c0_37, %c0_38] : memref<1x16xf32, #tpu.memory_space<vmem>>, vector<1x16xf32>
      %53 = arith.divf %51, %52 : vector<1x16xf32>
      %54 = arith.subf %50, %53 : vector<1x16xf32>
      %55 = vector.shape_cast %54 : vector<1x16xf32> to vector<1x1x16xf32>
      %c0_39 = arith.constant 0 : index
      %c0_40 = arith.constant 0 : index
      %c0_41 = arith.constant 0 : index
      %56 = vector.load %arg6[%c0_39, %c0_40, %c0_41] : memref<1x1x16xf32, #tpu.memory_space<vmem>>, vector<1x1x16xf32>
      tpu.vector_store %arg6[%c0_39, %c0_40, %c0_41], %55 {strides = array<i32>} : memref<1x1x16xf32, #tpu.memory_space<vmem>>, vector<1x1x16xf32>,
    } else {
    }
    return
  }
  func.func @transform_0(%arg0: i32, %arg1: i32) -> (i32, i32) {
    %c0_i32 = arith.constant 0 : i32
    %c0_i32_0 = arith.constant 0 : i32
    return %arg0, %c0_i32 : i32, i32
  }
  func.func @transform_1(%arg0: i32, %arg1: i32) -> (i32, i32) {
    %c0_i32 = arith.constant 0 : i32
    %c0_i32_0 = arith.constant 0 : i32
    return %arg1, %c0_i32 : i32, i32
  }
  func.func @transform_2(%arg0: i32, %arg1: i32) -> (i32, i32) {
    %c0_i32 = arith.constant 0 : i32
    %c0_i32_0 = arith.constant 0 : i32
    return %c0_i32, %arg0 : i32, i32
  }
  func.func @transform_3(%arg0: i32, %arg1: i32) -> (i32, i32) {
    %c0_i32 = arith.constant 0 : i32
    %c0_i32_0 = arith.constant 0 : i32
    return %arg1, %c0_i32 : i32, i32
  }
  func.func @transform_4(%arg0: i32, %arg1: i32) -> (i32, i32, i32) {
    %c0_i32 = arith.constant 0 : i32
    %c0_i32_0 = arith.constant 0 : i32
    %c0_i32_1 = arith.constant 0 : i32
    return %arg0, %c0_i32, %c0_i32_0 : i32, i32, i32
  }
}

</mosaic_0001>

<bundles_post_ra>
// kernel: tpu_custom_call.1
= control target key start
LH: loop header
LB: loop body
LE: loop exit
PB: predicated region body
PF: predicated region fallthrough
CT: control target
= control target key end

     0   :  { %v283_v2 = vmov 0   ;;  %s365_s0 = inlined_call_operand.vmem [shape: bf16[16,32], index: 0, kind: input, shape index: {}]   ;;  %s366_s1 = inlined_call_operand.vmem [shape: bf16[16,32], index: 1, kind: input, shape index: {}]   ;;  %s367_s2 = inlined_call_operand.vmem [shape: s32[1,16], index: 2, kind: input, shape index: {}]   ;;  %s368_s3 = inlined_call_operand.vmem [shape: s32[16,1], index: 3, kind: input, shape index: {}]   ;;  %s369_s4 = inlined_call_operand.hbm [shape: f32[1,1,16], index: 4, kind: output, shape index: {}]  }
   0x1   :  { %v74_v0 = vld [vmem:[%s368_s3] sm:$0xff]  ;;  %245 = vset.pattern.permute.xlu0 %v283_v2 }
   0x2   :  { %v238_v1 = vld [vmem:[%s365_s0] sm:$0xff]   ;;  %78 = vperm.xlu0 %245, %v74_v0  }
   0x3   :  { %v239_v3 = vunpack.c.l.bf16 %v238_v1  ;;  %v240_v4 = vunpack.c.h.bf16 %v238_v1 }
   0x4   :  { %9 = vsyncpa [#allocation8], 0  ;;  %vm31_vm0 = vcmask 257024   ;;  %v75_v9 = vld [vmem:[%s368_s3 + $0x8] sm:$0xff]  ;;  %vm53_vm1 = vcmask 261120   ;;  %v235_v12 = vld [vmem:[%s366_s1] sm:$0xff]  ;;  %v115_v14 = vlaneseq }
   0x5   :  { %v27_v5 = vmul.f32 14.285714, %v239_v3  ;;  %v28_v6 = vmul.f32 14.285714, %v240_v4  ;;  %vm34_vm2 = vcmask 122880   ;;  %v284_v13 = vmov 0.0  }
   0x6   :  { %36 = vst.msk [vmem:[#allocation4] sm:$0x1] %vm34_vm2, %v284_v13  ;;  %v246_v15 = vld [vmem:[%s367_s2] ss:$0 sm:$0xff]  ;;  %v330_v16 = vshrl.u32 %v115_v14, 7  ;;  %v332_v17 = vand.u32 127, %v115_v14 }
   0x7   :  { %v29_v7 = vpack.c.bf16 %v27_v5, %v27_v5  ;;  %v30_v8 = vpack.c.bf16 %v28_v6, %v28_v6  ;;  %37 = vst.msk [vmem:[#allocation5] sm:$0x1] %vm34_vm2, %v284_v13  ;;  %v285_v21 = vmov -inf   ;;  %vm91_vm5 = vcmask 130048   ;;  %s286_s1 = smov [#allocation7]   ;;  %s215_s25 = sshll.u32 %s369_s4, 4  ;;  %s216_s25 = int_to_ptr.hbm [resolvable:$true] %s215_s25 }
   0x8   :  { %38 = vst.msk [vmem:[#allocation6] sm:$0x1] %vm34_vm2, %v284_v13  ;;  %vm120_vm4 = vcmp.ne.s32.totalorder %v330_v16, %v332_v17  ;;  %v117_v20 = vadd.s32 8, %v330_v16  ;;  %s213_s2 = sshll.u32 %s286_s1, 4  ;;  %s214_s2 = int_to_ptr.vmem [resolvable:$true] %s213_s2 }
   0x9   :  { %32 = vst.msk [vmem:[#allocation2] sm:$0xf] %vm31_vm0, %v29_v7 }
   0xa   :  { %33 = vst.msk [vmem:[#allocation2 + $0x4] sm:$0xf] %vm31_vm0, %v30_v8  ;;  %81 = vperm.xlu0 %245, %v75_v9   ;;  %vm121_vm6 = vcmp.ne.s32.totalorder %v117_v20, %v332_v17 }
   0xb   :  { %35 = vst.msk [vmem:[#allocation3] sm:$0x1] %vm34_vm2, %v285_v21 }
   0xd   :  { %v140_v16 = vld [vmem:[#allocation4] sm:$0x1] }
   0xe   :  { %v155_v59 = vld [vmem:[#allocation5] sm:$0x1] }
   0xf   :  { %v169_v34 = vld [vmem:[#allocation6] sm:$0x1] }
  0x11   :  { %v236_v10 = vld [vmem:[#allocation2] sm:$0xff] }
  0x12   :  { %v58_v11 = vsel %vm53_vm1, %v236_v10, 0  ;;  %v90_v56 = vld [vmem:[#allocation3] sm:$0x1] }
  0x13   :  { %67 = vmatpush.bf16.xpose.msra.mxu0 %v58_v11 }
  0x1a   :  { %232 = vmatmul.msk.bf16.vlgmr.msra.gmra.mxu0 %vm53_vm1, %v235_v12 }
  0x74   :  { %v79_v18 = vpop.permute.xlu0 %78 }
  0x75   :  { %vm84_vm3 = vcmp.eq.s32.totalorder %v79_v18, %v246_v15 }
  0x76   :  { %v233_v19 = vsel %vm84_vm3, 1.0, %v284_v13 }
  0x77   :  { %v124_v22 = vsel %vm120_vm4, %v233_v19, 0.0 }
  0x78   :  { %v170_v24 = vsel %vm91_vm5, %v124_v22, 0.0 }
  0x7c   :  { %v82_v23 = vpop.permute.xlu0 %81 }
  0x7d   :  { %vm85_vm7 = vcmp.eq.s32.totalorder %v82_v23, %v246_v15 }
  0x7e   :  { %v234_v25 = vsel %vm85_vm7, 1.0, %v284_v13 }
  0x7f   :  { %v125_v26 = vsel %vm121_vm6, %v234_v25, 0.0 }
  0x80   :  { %v171_v27 = vsel %vm91_vm5, %v125_v26, 0.0 }
  0x81   :  { %v172_v28 = vadd.f32 %v171_v27, %v170_v24 }
  0x83   :  { %v173_v29 = vrot.slane %v172_v28, 4 }
  0x85   :  { %v174_v30 = vadd.f32 %v173_v29, %v172_v28 }
  0x87   :  { %v175_v31 = vrot.slane %v174_v30, 2 }
  0x89   :  { %v176_v32 = vadd.f32 %v175_v31, %v174_v30 }
  0x8b   :  { %v177_v33 = vrot.slane %v176_v32, 1 }
  0x8d   :  { %v178_v35 = vadd.f32 %v177_v33, %v176_v32 }
  0x8f   :  { %v179_v36 = vadd.f32 %v178_v35, %v169_v34 }
  0x91   :  { %180 = vst.msk [vmem:[#allocation6] sm:$0x1] %vm34_vm2, %v179_v36 }
  0x97   :  { %v69_v37 = vpop.f32.mrf.mxu0 }
  0x98   :  { %v156_v38 = vmul.f32 %v124_v22, %v69_v37  ;;  %v92_v40 = vsel %vm91_vm5, %v69_v37, -inf  ;;  %v190_v12 = vld [vmem:[#allocation6] sm:$0x1] }
  0x99   :  { %vm196_vm8 = vweird.f32 %v190_v12  ;;  %v202_v28 = vand.u32 2147483648, %v190_v12  ;;  %v200_v31 = vand.u32 2147483647, %v190_v12 }
  0x9a   :  { %v158_v44 = vsel %vm91_vm5, %v156_v38, 0.0 }
  0x9b   :  { %v203_v32 = vor.u32 1.1754944e-38, %v202_v28  ;;  %vm201_vm11 = vcmp.eq.f32.partialorder %v200_v31, 8.507059e+37 }
  0x9f   :  { %v71_v39 = vpop.f32.mrf.mxu0 }
  0xa0   :  { %v93_v41 = vsel %vm91_vm5, %v71_v39, -inf  ;;  %v157_v42 = vmul.f32 %v125_v26, %v71_v39 }
  0xa1   :  { %v94_v43 = vmax.f32 %v92_v40, %v93_v41 }
  0xa2   :  { %v159_v45 = vsel %vm91_vm5, %v157_v42, 0.0 }
  0xa3   :  { %v95_v46 = vrot.slane %v94_v43, 4  ;;  %v160_v47 = vadd.f32 %v159_v45, %v158_v44 }
  0xa5   :  { %v96_v48 = vmax.f32 %v94_v43, %v95_v46  ;;  %v161_v49 = vrot.slane %v160_v47, 4 }
  0xa7   :  { %v97_v50 = vrot.slane %v96_v48, 2  ;;  %v162_v51 = vadd.f32 %v161_v49, %v160_v47 }
  0xa9   :  { %v98_v52 = vmax.f32 %v96_v48, %v97_v50  ;;  %v163_v53 = vrot.slane %v162_v51, 2 }
  0xab   :  { %v99_v54 = vrot.slane %v98_v52, 1  ;;  %v164_v55 = vadd.f32 %v163_v53, %v162_v51 }
  0xad   :  { %v100_v57 = vmax.f32 %v98_v52, %v99_v54  ;;  %v165_v58 = vrot.slane %v164_v55, 1 }
  0xaf   :  { %v101_v60 = vmax.f32 %v90_v56, %v100_v57  ;;  %v166_v61 = vadd.f32 %v165_v58, %v164_v55 }
  0xb1   :  { %v103_v62 = vperm.slane %v101_v60, 0  ;;  %154 = vst.msk [vmem:[#allocation3] sm:$0x1] %vm34_vm2, %v101_v60  ;;  %v167_v63 = vadd.f32 %v166_v61, %v155_v59  ;;  %v137_v4 = vsub.f32 %v90_v56, %v101_v60 }
  0xb3   :  { %v105_v0 = vsub.f32 %v69_v37, %v103_v62  ;;  %v106_v1 = vsub.f32 %v71_v39, %v103_v62  ;;  %168 = vst.msk [vmem:[#allocation5] sm:$0x1] %vm34_vm2, %v167_v63  ;;  %v138_v10 = vmul.f32 1.442695, %v137_v4 }
  0xb5   :  { %v107_v2 = vmul.f32 1.442695, %v105_v0  ;;  %v109_v3 = vmul.f32 1.442695, %v106_v1 }
  0xb7   :  { %247 = vpow2.f32 %v107_v2 }
  0xb8   :  { %249 = vpow2.f32 %v109_v3  ;;  %v184_v38 = vld [vmem:[#allocation3] sm:$0x1] }
  0xb9   :  { %251 = vrcp.f32 %v190_v12 }
  0xba   :  { %253 = vpow2.f32 %v138_v10  ;;  %v189_v35 = vld [vmem:[#allocation5] sm:$0x1] }
  0xbd   :  { %v248_v5 = vpop.eup %247 }
  0xbe   :  { %v250_v6 = vpop.eup %249  ;;  %v122_v7 = vsel %vm120_vm4, %v248_v5, 0.0 }
  0xbf   :  { %v123_v8 = vsel %vm121_vm6, %v250_v6, 0.0  ;;  %v142_v9 = vsel %vm91_vm5, %v122_v7, 0.0  ;;  %v252_v19 = vpop.eup %251 }
  0xc0   :  { %v143_v11 = vsel %vm91_vm5, %v123_v8, 0.0  ;;  %v254_v22 = vpop.eup %253  ;;  %v192_v24 = vmul.f32 %v252_v19, %v190_v12  ;;  %vm197_vm9 = vweird.f32 %v252_v19 }
  0xc1   :  { %v144_v13 = vadd.f32 %v143_v11, %v142_v9  ;;  %v141_v17 = vmul.f32 %v254_v22, %v140_v16  ;;  %vm198_vm10 = vmor %vm196_vm8, %vm197_vm9 }
  0xc2   :  { %v193_v26 = vsub.f32 1.0, %v192_v24 }
  0xc3   :  { %v145_v14 = vrot.slane %v144_v13, 4 }
  0xc4   :  { %v194_v27 = vmul.f32 %v252_v19, %v193_v26 }
  0xc5   :  { %v146_v15 = vadd.f32 %v145_v14, %v144_v13 }
  0xc6   :  { %v195_v30 = vadd.f32 %v252_v19, %v194_v27 }
  0xc7   :  { %v147_v18 = vrot.slane %v146_v15, 2 }
  0xc8   :  { %v199_v33 = vsel %vm198_vm10, %v252_v19, %v195_v30 }
  0xc9   :  { %v148_v21 = vadd.f32 %v147_v18, %v146_v15  ;;  %v204_v36 = vsel %vm201_vm11, %v203_v32, %v199_v33 }
  0xca   :  { %v205_v40 = vmul.f32 %v204_v36, %v189_v35 }
  0xcb   :  { %v149_v23 = vrot.slane %v148_v21, 1 }
  0xcd   :  { %v150_v20 = vadd.f32 %v149_v23, %v148_v21 }
  0xcf   :  { %v151_v25 = vadd.f32 %v150_v20, %v141_v17 }
  0xd1   :  { %153 = vst.msk [vmem:[#allocation4] sm:$0x1] %vm34_vm2, %v151_v25 }
  0xd8   :  { %v185_v29 = vld [vmem:[#allocation4] sm:$0x1] }
  0xd9   :  { %255 = vlog2.f32 %v185_v29 }
  0xdf   :  { %v256_v34 = vpop.eup %255 }
  0xe0   :  { %v187_v37 = vmul.f32 0.6931472, %v256_v34 }
  0xe2   :  { %v188_v39 = vadd.f32 %v187_v37, %v184_v38 }
  0xe4   :  { %v206_v41 = vsub.f32 %v188_v39, %v205_v40 }
  0xe6   :  { %207 = vst.msk [vmem:[#allocation7] sm:$0x1] %vm34_vm2, %v206_v41 }
  0xe7   :  { %218 = dma.vmem_to_hbm [thread:$0]  %s214_s2, 16, %s216_s25, [#allocation8]  }
  0xe8   :  { %281 = dma.done.wait [#allocation8], 16  }
  0xe9   :  { %282 = vsyncadd [#allocation8], 4294967280 }
  0xea   :  { %223 = vsyncpa [#allocation8], 1 }

</bundles_post_ra>
